<compile_context>
chip_gen: v5e
topology: v5e:2x2
jax: 0.10.0
libtpu: 0.0.40
codegen_flags: <defaults>
</compile_context>

<pallas_src>
import jax
import jax.numpy as jnp
from jax.experimental import pallas as pl
from jax.experimental.pallas import tpu as pltpu

EPS = 1e-5
NUM_GROUPS = 32


# --------------------------------------------------------------------------------
# small helpers
# --------------------------------------------------------------------------------

def _row_tile(H):
    """Largest row tile (<=16) dividing H that leaves >=2 tiles; else the whole H."""
    for th in (16, 8, 4, 2, 1):
        if H % th == 0 and H // th >= 2:
            return th
    return H


def _vmem_limit(need_bytes):
    """Per-generation VMEM budget: 2x a generous per-step estimate, capped at 85%
    of the chip's physical VMEM (v5e/v6e: ~108 MiB usable, v7x: ~54 MiB)."""
    try:
        cap = int(pltpu.get_tpu_info().vmem_capacity_bytes)
    except Exception:                      # pragma: no cover - conservative fallback
        cap = 64 << 20
    return int(min(max(2 * int(need_bytes), 32 << 20), (cap * 85) // 100))


def _norm_silu(v, sc, sh):
    """GroupNorm folded into a per-channel affine, then SiLU.
    exp and the (approx) reciprocal both go to the EUP slot -> no VALU divide."""
    y = v * sc + sh
    return y * pl.reciprocal(1.0 + jnp.exp(-y), approx=True)


def _normalized_rows(top_ref, mid_ref, bot_ref, aff_ref, TH, W, C):
    """Return the GN+SiLU'd (TH+2, W, C) f32 row segment (1-row halo each side).
    Halo rows that fall outside the image are zeroed so conv sees its zero padding."""
    aff = aff_ref[...].reshape(2, C)
    sc = aff[0:1, :]                                   # gamma * inv_std        (1, C)
    sh = aff[1:2, :]                                   # beta - mean*gamma*inv  (1, C)
    t = pl.program_id(1)
    nt = pl.num_programs(1)
    top_valid = (t > 0).astype(jnp.float32)
    bot_valid = (t < nt - 1).astype(jnp.float32)
    top = _norm_silu(top_ref[...].astype(jnp.float32).reshape(W, C), sc, sh) * top_valid
    bot = _norm_silu(bot_ref[...].astype(jnp.float32).reshape(W, C), sc, sh) * bot_valid
    mid = _norm_silu(mid_ref[...].astype(jnp.float32).reshape(TH * W, C), sc, sh)
    return jnp.concatenate([top, mid, bot], axis=0).reshape(TH + 2, W, C)


def _conv3x3_rows(hseg, wk_ref, b_ref, TH, W, C):
    """3x3 same-conv of the (TH+2, W, C) halo segment -> (TH*W, Cout) f32.
    Width taps folded into K (patch is (., 3C) bf16); the three height taps are three
    row-shifted slices of the SAME patch -> three equal-size bf16 MXU matmuls with
    f32 accumulation and no zero-padded output temporaries."""
    hb = hseg.astype(jnp.bfloat16)
    zc = jnp.zeros((TH + 2, 1, C), jnp.bfloat16)
    left = jnp.concatenate([zc, hb[:, :W - 1, :]], axis=1)       # in[y, x-1]
    right = jnp.concatenate([hb[:, 1:, :], zc], axis=1)          # in[y, x+1]
    patch = jnp.concatenate([left, hb, right], axis=2).reshape((TH + 2) * W, 3 * C)
    n = TH * W
    out = jnp.dot(patch[0:n], wk_ref[0], preferred_element_type=jnp.float32)           # ky=0
    out = out + jnp.dot(patch[W:W + n], wk_ref[1], preferred_element_type=jnp.float32)  # ky=1
    out = out + jnp.dot(patch[2 * W:2 * W + n], wk_ref[2],
                        preferred_element_type=jnp.float32)                             # ky=2
    return out + b_ref[...]


def _gn_affine(partial_stats, gamma, beta, hw):
    """partial_stats: (B, T, 2, C) per-tile channel sums.  Returns (B, 2, C) f32 with
    row 0 = gamma*inv_std and row 1 = beta - mean*gamma*inv_std (per channel).
    This is O(B*C) work, done in plain XLA between the Pallas passes."""
    B, _, _, C = partial_stats.shape
    cpg = C // NUM_GROUPS
    s = jnp.sum(partial_stats.astype(jnp.float32), axis=1)              # (B, 2, C)
    sg = jnp.sum(s.reshape(B, 2, NUM_GROUPS, cpg), axis=-1)             # (B, 2, G)
    inv_n = 1.0 / float(hw * cpg)
    mean = sg[:, 0] * inv_n
    var = jnp.maximum(sg[:, 1] * inv_n - mean * mean, 0.0)
    inv = jax.lax.rsqrt(var + EPS)
    mean_c = jnp.repeat(mean, cpg, axis=-1)                             # (B, C)
    inv_c = jnp.repeat(inv, cpg, axis=-1)
    scale = inv_c * gamma.reshape(1, C)
    shift = beta.reshape(1, C) - mean_c * scale
    return jnp.stack([scale, shift], axis=1)                            # (B, 2, C)


# --------------------------------------------------------------------------------
# kernels
# --------------------------------------------------------------------------------

def _make_stats_kernel(TH, W, C):
    def kernel(x_ref, st_ref):
        x = x_ref[...].astype(jnp.float32).reshape(TH * W, C)
        s1 = jnp.sum(x, axis=0, keepdims=True)
        s2 = jnp.sum(x * x, axis=0, keepdims=True)
        st_ref[...] = jnp.concatenate([s1, s2], axis=0).reshape(1, 1, 2, C)
    return kernel


def _make_stage1_kernel(TH, W, Cin, Cout):
    """GN1 + SiLU + conv1 on one row tile; emits bf16 h1 tile + GN2 partial stats."""
    def kernel(top_ref, mid_ref, bot_ref, aff_ref, wk_ref, b_ref, h1_ref, st_ref):
        hseg = _normalized_rows(top_ref, mid_ref, bot_ref, aff_ref, TH, W, Cin)
        out = _conv3x3_rows(hseg, wk_ref, b_ref, TH, W, Cin)            # (TH*W, Cout) f32
        h1_ref[0] = out.reshape(TH, W, Cout).astype(h1_ref.dtype)
        s1 = jnp.sum(out, axis=0, keepdims=True)
        s2 = jnp.sum(out * out, axis=0, keepdims=True)
        st_ref[...] = jnp.concatenate([s1, s2], axis=0).reshape(1, 1, 2, Cout)
    return kernel


def _make_stage2_kernel(TH, W, Cin, Cout, has_proj):
    """GN2 + SiLU + conv2 on one row tile of h1, plus the residual add."""
    def kernel(top_ref, mid_ref, bot_ref, aff_ref, wk_ref, b_ref, x_ref, *rest):
        if has_proj:
            wr_ref, br_ref, o_ref = rest
        else:
            (o_ref,) = rest
        hseg = _normalized_rows(top_ref, mid_ref, bot_ref, aff_ref, TH, W, Cout)
        out = _conv3x3_rows(hseg, wk_ref, b_ref, TH, W, Cout)           # (TH*W, Cout) f32
        xr = x_ref[0].reshape(TH * W, Cin)
        if has_proj:
            # cast straight to bf16 -- no intermediate f32 copy of the residual tile
            res = jnp.dot(xr.astype(jnp.bfloat16), wr_ref[...],
                          preferred_element_type=jnp.float32) + br_ref[...]
        else:
            res = xr.astype(jnp.float32)
        o_ref[0] = (out + res).reshape(TH, W, Cout).astype(o_ref.dtype)
    return kernel


# --------------------------------------------------------------------------------
# wrappers
# --------------------------------------------------------------------------------

def vae_residual_block_nhwc(x_nhwc, params):
    """NHWC entry point (preferred: keep the surrounding VAE in NHWC to avoid
    per-block relayouts).  x_nhwc: (B, H, W, Cin) -> (B, H, W, Cout)."""
    B, H, W, Cin = x_nhwc.shape
    Cout = params["w1"].shape[-1]
    assert Cin % NUM_GROUPS == 0 and Cout % NUM_GROUPS == 0
    has_proj = (Cin != Cout)
    TH = _row_tile(H)
    T = H // TH
    xsz = x_nhwc.dtype.itemsize

    # fold 3x3 taps into K ((3,3,C,Cout) -> (3, 3C, Cout)); MXU weights in bf16
    wk1 = params["w1"].reshape(3, 3 * Cin, Cout).astype(jnp.bfloat16)
    wk2 = params["w2"].reshape(3, 3 * Cout, Cout).astype(jnp.bfloat16)
    b1 = params["b1"].reshape(1, Cout).astype(jnp.float32)
    b2 = params["b2"].reshape(1, Cout).astype(jnp.float32)

    # index maps (grid = (b, t))
    row_lo = lambda b, t: (b, jnp.maximum(t * TH - 1, 0), 0, 0)      # halo row above
    row_hi = lambda b, t: (b, jnp.minimum(t * TH + TH, H - 1), 0, 0)  # halo row below
    tile_ix = lambda b, t: (b, t, 0, 0)
    per_b = lambda b, t: (b, 0, 0)
    const3 = lambda b, t: (0, 0, 0)
    const2 = lambda b, t: (0, 0)

    def cparams(need_bytes):
        return pltpu.CompilerParams(
            dimension_semantics=("parallel", "parallel"),
            vmem_limit_bytes=_vmem_limit(need_bytes))

    # ---- pass 1: GN1 partial stats over row tiles --------------------------------
    need1 = TH * W * Cin * (2 * xsz + 12) + 4 * Cin * 8
    stats1 = pl.pallas_call(
        _make_stats_kernel(TH, W, Cin),
        out_shape=jax.ShapeDtypeStruct((B, T, 2, Cin), jnp.float32),
        grid_spec=pltpu.PrefetchScalarGridSpec(
            num_scalar_prefetch=0, grid=(B, T),
            in_specs=[pl.BlockSpec((1, TH, W, Cin), tile_ix)],
            out_specs=pl.BlockSpec((1, 1, 2, Cin), tile_ix)),
        compiler_params=cparams(need1),
    )(x_nhwc)
    aff1 = _gn_affine(stats1, params["g1"], params["be1"], H * W)

    # ---- pass 2: GN1+SiLU -> conv1, emit h1 (bf16) + GN2 partial stats ------------
    need2 = (2 * ((TH + 2) * W * Cin * xsz + TH * W * Cout * 2 + 2 * Cout * 4 + 2 * Cin * 4)
             + 2 * (wk1.size * 2 + Cout * 4)
             + (TH + 2) * W * Cin * 14            # f32 segment + bf16 shifts + 3C patch
             + 2 * TH * W * Cout * 4)
    h1, stats2 = pl.pallas_call(
        _make_stage1_kernel(TH, W, Cin, Cout),
        out_shape=(jax.ShapeDtypeStruct((B, H, W, Cout), jnp.bfloat16),
                   jax.ShapeDtypeStruct((B, T, 2, Cout), jnp.float32)),
        grid_spec=pltpu.PrefetchScalarGridSpec(
            num_scalar_prefetch=0, grid=(B, T),
            in_specs=[
                pl.BlockSpec((1, 1, W, Cin), row_lo),
                pl.BlockSpec((1, TH, W, Cin), tile_ix),
                pl.BlockSpec((1, 1, W, Cin), row_hi),
                pl.BlockSpec((1, 2, Cin), per_b),
                pl.BlockSpec((3, 3 * Cin, Cout), const3),
                pl.BlockSpec((1, Cout), const2),
            ],
            out_specs=(pl.BlockSpec((1, TH, W, Cout), tile_ix),
                       pl.BlockSpec((1, 1, 2, Cout), tile_ix))),
        compiler_params=cparams(need2),
    )(x_nhwc, x_nhwc, x_nhwc, aff1, wk1, b1)
    aff2 = _gn_affine(stats2, params["g2"], params["be2"], H * W)

    # ---- pass 3: GN2+SiLU -> conv2 + residual -------------------------------------
    in_specs = [
        pl.BlockSpec((1, 1, W, Cout), row_lo),
        pl.BlockSpec((1, TH, W, Cout), tile_ix),
        pl.BlockSpec((1, 1, W, Cout), row_hi),
        pl.BlockSpec((1, 2, Cout), per_b),
        pl.BlockSpec((3, 3 * Cout, Cout), const3),
        pl.BlockSpec((1, Cout), const2),
        pl.BlockSpec((1, TH, W, Cin), tile_ix),      # residual x tile
    ]
    inputs = [h1, h1, h1, aff2, wk2, b2, x_nhwc]
    proj_bytes = 0
    if has_proj:
        in_specs += [pl.BlockSpec((Cin, Cout), const2), pl.BlockSpec((1, Cout), const2)]
        inputs += [params["wr"].astype(jnp.bfloat16),
                   params["br"].reshape(1, Cout).astype(jnp.float32)]
        proj_bytes = Cin * Cout * 2 + Cout * 4
    need3 = (2 * ((TH + 2) * W * Cout * 2 + TH * W * (Cin + Cout) * xsz + 2 * Cout * 4 * 2)
             + 2 * (wk2.size * 2 + Cout * 4 + proj_bytes)
             + (TH + 2) * W * Cout * 14
             + 2 * TH * W * Cout * 4)
    out = pl.pallas_call(
        _make_stage2_kernel(TH, W, Cin, Cout, has_proj),
        out_shape=jax.ShapeDtypeStruct((B, H, W, Cout), x_nhwc.dtype),
        grid_spec=pltpu.PrefetchScalarGridSpec(
            num_scalar_prefetch=0, grid=(B, T),
            in_specs=in_specs,
            out_specs=pl.BlockSpec((1, TH, W, Cout), tile_ix)),
        compiler_params=cparams(need3),
    )(*inputs)
    return out


def vae_residual_block(x_nchw, params):
    """PyTorch-layout wrapper: (B, Cin, H, W) -> (B, Cout, H, W).
    For a full VAE, keep activations NHWC and call vae_residual_block_nhwc directly
    so these two full-HBM relayouts disappear."""
    x_nhwc = jnp.transpose(x_nchw, (0, 2, 3, 1))
    out = vae_residual_block_nhwc(x_nhwc, params)
    return jnp.transpose(out, (0, 3, 1, 2))


# --------------------------------------------------------------------------------
# pure-JAX reference + self-test
# --------------------------------------------------------------------------------

def _silu_ref(x):
    return x * (1.0 / (1.0 + jnp.exp(-x)))


def reference(x_nchw, params):
    """Pure-JAX f32 NHWC reference matching the PyTorch module semantics."""
    x = jnp.transpose(x_nchw, (0, 2, 3, 1)).astype(jnp.float32)

    def gn(h, gamma, beta):
        B, H, W, C = h.shape
        cpg = C // NUM_GROUPS
        hg = h.reshape(B, H, W, NUM_GROUPS, cpg)
        mean = jnp.mean(hg, axis=(1, 2, 4), keepdims=True)
        var = jnp.mean((hg - mean) ** 2, axis=(1, 2, 4), keepdims=True)
        hn = ((hg - mean) / jnp.sqrt(var + EPS)).reshape(B, H, W, C)
        return hn * gamma.reshape(1, 1, 1, C) + beta.reshape(1, 1, 1, C)

    def conv(h, w, b):
        o = jax.lax.conv_general_dilated(
            h, w, (1, 1), "SAME", dimension_numbers=("NHWC", "HWIO", "NHWC"))
        return o + b.reshape(1, 1, 1, -1)

    res = x
    if "wr" in params:
        Cin, Cout = params["wr"].shape
        res = conv(x, params["wr"].reshape(1, 1, Cin, Cout), params["br"])
    h = _silu_ref(gn(x, params["g1"], params["be1"]))
    h = conv(h, params["w1"], params["b1"])
    h = _silu_ref(gn(h, params["g2"], params["be2"]))
    h = conv(h, params["w2"], params["b2"])
    return jnp.transpose(h + res, (0, 3, 1, 2))


if __name__ == "__main__":
    key = jax.random.PRNGKey(0)

    def make_params(k, Cin, Cout, with_proj):
        ks = jax.random.split(k, 10)
        p = dict(
            g1=1.0 + 0.1 * jax.random.normal(ks[0], (1, Cin), jnp.float32),
            be1=0.1 * jax.random.normal(ks[1], (1, Cin), jnp.float32),
            w1=0.05 * jax.random.normal(ks[2], (3, 3, Cin, Cout), jnp.float32),
            b1=0.05 * jax.random.normal(ks[3], (1, Cout), jnp.float32),
            g2=1.0 + 0.1 * jax.random.normal(ks[4], (1, Cout), jnp.float32),
            be2=0.1 * jax.random.normal(ks[5], (1, Cout), jnp.float32),
            w2=0.05 * jax.random.normal(ks[6], (3, 3, Cout, Cout), jnp.float32),
            b2=0.05 * jax.random.normal(ks[7], (1, Cout), jnp.float32),
        )
        if with_proj:
            p["wr"] = 0.1 * jax.random.normal(ks[8], (Cin, Cout), jnp.float32)
            p["br"] = 0.05 * jax.random.normal(ks[9], (1, Cout), jnp.float32)
        return p

    # GroupNorm(32, C) requires C % 32 == 0 -> smallest channels are 32/64.
    # bf16 MXU inputs (+ bf16 h1 intermediate) vs pure-f32 reference -> 2e-2 tolerance.
    TOL = 2e-2
    B, H, W = 2, 16, 16                      # row tile TH=8 -> 2 tiles: exercises halos
    k1, k2, k3, k4 = jax.random.split(key, 4)

    # case 1: Cin != Cout -> 1x1 projection on the skip path
    Cin, Cout = 32, 64
    x = jax.random.normal(k1, (B, Cin, H, W), jnp.float32)
    params = make_params(k2, Cin, Cout, with_proj=True)
    out = jax.block_until_ready(vae_residual_block(x, params))
    ref = reference(x, params)
    assert out.shape == (B, Cout, H, W), out.shape
    assert jnp.allclose(out, ref, atol=TOL, rtol=TOL), \
        float(jnp.max(jnp.abs(out - ref)))

    # case 2: Cin == Cout -> identity skip (no projection matmul in the kernel)
    Cin2 = Cout2 = 32
    x2 = jax.random.normal(k3, (B, Cin2, H, W), jnp.float32)
    params2 = make_params(k4, Cin2, Cout2, with_proj=False)
    out2 = jax.block_until_ready(vae_residual_block(x2, params2))
    ref2 = reference(x2, params2)
    assert out2.shape == (B, Cout2, H, W), out2.shape
    assert jnp.allclose(out2, ref2, atol=TOL, rtol=TOL), \
        float(jnp.max(jnp.abs(out2 - ref2)))

    print("KERNEL_OK")
</pallas_src>

<mosaic_0001>
module attributes {stable_mosaic.version = 11 : i64} {
  func.func @kernel(%arg0: i32, %arg1: i32, %arg2: memref<1x8x16x32xf32, #tpu.memory_space<vmem>>, %arg3: memref<1x1x2x32xf32, #tpu.memory_space<vmem>>) attributes {dimension_semantics = [#tpu.dimension_semantics<parallel>, #tpu.dimension_semantics<parallel>], iteration_bounds = array<i64: 2, 2>, scalar_prefetch = 0 : i64, scratch_operands = 0 : i64, tpu.core_type = #tpu.core_type<tc>, window_params = [{transform_indices = @transform_0, window_bounds = array<i64: 1, 8, 16, 32>}, {transform_indices = @transform_1, window_bounds = array<i64: 1, 1, 2, 32>}]} {
    %c0 = arith.constant 0 : index
    %c0_0 = arith.constant 0 : index
    %c0_1 = arith.constant 0 : index
    %c0_2 = arith.constant 0 : index
    %0 = vector.load %arg2[%c0, %c0_0, %c0_1, %c0_2] : memref<1x8x16x32xf32, #tpu.memory_space<vmem>>, vector<1x8x16x32xf32>
    %1 = vector.shape_cast %0 : vector<1x8x16x32xf32> to vector<128x32xf32>
    %cst = arith.constant dense<0.000000e+00> : vector<32xf32>
    %2 = vector.multi_reduction <add>, %1, %cst [0] : vector<128x32xf32> to vector<32xf32>
    %3 = vector.shape_cast %2 : vector<32xf32> to vector<1x32xf32>
    %4 = arith.mulf %1, %1 : vector<128x32xf32>
    %cst_3 = arith.constant dense<0.000000e+00> : vector<32xf32>
    %5 = vector.multi_reduction <add>, %4, %cst_3 [0] : vector<128x32xf32> to vector<32xf32>
    %6 = vector.shape_cast %5 : vector<32xf32> to vector<1x32xf32>
    %7 = tpu.concatenate %3, %6 in 0 : vector<1x32xf32>, vector<1x32xf32> -> vector<2x32xf32>
    %8 = vector.shape_cast %7 : vector<2x32xf32> to vector<1x1x2x32xf32>
    %c0_4 = arith.constant 0 : index
    %c0_5 = arith.constant 0 : index
    %c0_6 = arith.constant 0 : index
    %c0_7 = arith.constant 0 : index
    %9 = vector.load %arg3[%c0_4, %c0_5, %c0_6, %c0_7] : memref<1x1x2x32xf32, #tpu.memory_space<vmem>>, vector<1x1x2x32xf32>
    tpu.vector_store %arg3[%c0_4, %c0_5, %c0_6, %c0_7], %8 {strides = array<i32>} : memref<1x1x2x32xf32, #tpu.memory_space<vmem>>, vector<1x1x2x32xf32>,
    return
  }
  func.func @transform_0(%arg0: i32, %arg1: i32) -> (i32, i32, i32, i32) {
    %c0_i32 = arith.constant 0 : i32
    %c0_i32_0 = arith.constant 0 : i32
    %c0_i32_1 = arith.constant 0 : i32
    return %arg0, %arg1, %c0_i32, %c0_i32_0 : i32, i32, i32, i32
  }
  func.func @transform_1(%arg0: i32, %arg1: i32) -> (i32, i32, i32, i32) {
    %c0_i32 = arith.constant 0 : i32
    %c0_i32_0 = arith.constant 0 : i32
    %c0_i32_1 = arith.constant 0 : i32
    return %arg0, %arg1, %c0_i32, %c0_i32_0 : i32, i32, i32, i32
  }
}

</mosaic_0001>

<bundles_post_ra>
// kernel: tpu_custom_call.1
= control target key start
LH: loop header
LB: loop body
LE: loop exit
PB: predicated region body
PF: predicated region fallthrough
CT: control target
= control target key end

     0   :  { %6 = vsyncpa [#allocation3], 0  ;;  %s805_s0 = inlined_call_operand.hbm [shape: f32[2,16,16,32], index: 0, kind: input, shape index: {}]   ;;  %s806_s1 = inlined_call_operand.hbm [shape: f32[2,2,2,32], index: 1, kind: output, shape index: {}]  }
   0x1   :  { %8 = vsyncpa [#allocation3 + $0x1], 0 }
   0x2   :  { %9 = vsyncpa [#allocation4], 0 }
   0x3   :  { %11 = vsyncpa [#allocation4 + $0x1], 0  ;;  %s612_s6 = smov 0   ;;  %s614_s7 = smov 0  }
   0x4   :  { %s616_s8 = smov 0   ;;  %s618_s9 = smov 0  }
   0x5   :  { %s620_s10 = smov 0   ;;  %s622_s11 = smov 0  }
   0x6   :  { %s624_s12 = smov 0   ;;  %s626_s13 = smov 0  }
   0x7 LB: > { %s372_s14 = sadd.s32 4294967295, %s598_s13   ;;  %s373_s15 = sadd.s32 4294967294, %s598_s13   ;;  %s598_s13 = sphi %s626_s13, %s17_s13   ;;  %s594_s12 = sphi %s624_s12, %s820_s12   ;;  %s590_s11 = sphi %s622_s11, %s819_s11   ;;  %s586_s10 = sphi %s620_s10, %s818_s10   ;;  %s582_s9 = sphi %s618_s9, %s817_s9   ;;  %s578_s8 = sphi %s616_s8, %s816_s8   ;;  %s574_s7 = sphi %s614_s7, %s815_s7   ;;  %s570_s6 = sphi %s612_s6, %s814_s6  }
   0x8   : > { %s26_s16 = sadd.s32 1, %s590_s11  ;;  %s29_s17 = sadd.s32 1, %s594_s12 }
   0x9   : > { %p27_p0 = scmp.ge.s32.totalorder %s26_s16, 2  ;;  %s38_s18 = sadd.s32 1, %s578_s8 }
   0xa   : > { %p45_p1 = scmp.ne.s32.totalorder %s578_s8, %s574_s7  ;;  %p46_p2 = scmp.eq.s32.totalorder %s598_s13, 0 }
   0xb   : > { %s822_s16 = smov (%p27_p0, %s26_s16), 0  ;;  %s824_s17 = smov (!%p27_p0, %s29_s17), %s594_s12 }
   0xc   : > { %s34_s19 = ssub.s32 %s590_s11, %s822_s16  ;;  %p665_p3 = por %p46_p2, %p45_p1 }
   0xd   : > { %p31_p4 = scmp.ge.s32.totalorder %s824_s17, 2  ;;  %p51_p5 = scmp.ne.s32.totalorder %s574_s7, %s570_s6 }
   0xe   : > { %p52_p6 = scmp.eq.s32.totalorder %s372_s14, 0  ;;  %p77_p7 = scmp.eq.s32.totalorder %s372_s14, 3 }
   0xf   : > { %s826_s17 = smov (%p31_p4, %s824_s17), 0  ;;  %p83_p10 = scmp.eq.s32.totalorder %s373_s15, 3 }
  0x10   : > { %809 = sst [smem:[#allocation8_spill]] %s826_s17  ;;  %p673_p8 = por %p52_p6, %p51_p5 }
  0x11   : > { %p677_p9 = por %p77_p7, %p45_p1  ;;  %s33_s23 = ssub.s32 %s594_s12, %s826_s17 }
  0x12   : > { %s35_s24 = sor.u32 %s34_s19, %s33_s23  ;;  %p683_p12 = por %p83_p10, %p51_p5 }
  0x13   : > { %p36_p11 = scmp.eq.s32.totalorder %s35_s24, 0  ;;  %p402_p13 = scmp.lt.s32.totalorder %s598_s13, 4 }
  0x14   : > { %s103_s26 = sand.u32 1, %s578_s8   ;;  %s389_s29 = sshll.u32 %s590_s11, 4 }
  0x15   : > { %s690_s27 = scalar_select %p36_p11, %s578_s8, %s38_s18  }
  0x16   : > { %s376_s28 = sshll.u32 %s103_s26, 7  ;;  %s379_s30 = sshll.u32 %s594_s12, 5 }
  0x17   : > { %s107_s2 = scalar_lea.vmem [#allocation2], %s376_s28  ;;  %s113_s4 = sadd.s32 %s389_s29, %s379_s30 }
  0x18   : > { %s118_s3 = sshll.u32 %s107_s2, 4  ;;  %s380_s5 = sshll.u32 %s113_s4, 3  ;;  %s119_s3 = int_to_ptr.vmem [resolvable:$true] %s118_s3 }
  0x19   : > { %p395_p0 = pnand %p402_p13, %p665_p3  ;;  %s115_s19 = scalar_lea.hbm %s805_s0, %s380_s5 }
  0x1a   : > { %s116_s23 = sshll.u32 %s115_s19, 4  ;;  %s104_s18 = scalar_lea.sflag [#allocation3], %s103_s26  ;;  %s117_s23 = int_to_ptr.hbm [resolvable:$true] %s116_s23 }
  0x1b   : > { %s600_s24 = smov 128   ;;  %s601_s17 = smov 8  }
  0x1c   : > { %397 = dma.hbm_to_vmem [thread:$0]  (!%p395_p0), %s117_s23, 2048, %s119_s3, %s104_s18, %s600_s24, %s600_s24, %s601_s17  }
  0x1d   : > { %p381_p1 = scmp.ge.s32.totalorder %s598_s13, 1  ;;  %p126_p2 = scmp.lt.s32.totalorder %s598_s13, 5 }
  0x1f   : > { %p127_p4 = pnand %p381_p1, %p126_p2 }
  0x20   : > { %s702_s28 = sand.u32 (!%p127_p4), 1, %s574_s7  }
  0x21   : > { %130 = sbr.rel (%p127_p4) target bundleno = 90 (0x5a), region = 24  ;;  %s382_s20 = sshll.u32 (!%p127_p4), %s702_s28, 7 }
  0x22   : > { %s133_s29 = scalar_lea.sflag (!%p127_p4), [#allocation3], %s702_s28  ;;  %s706_s30 = scalar_lea.vmem (!%p127_p4), [#allocation2], %s382_s20 }
  0x26   : > { %561 = dma.done.wait (%p673_p8), %s133_s29, 2048  }
  0x27   : > { %563 = vsyncadd (%p673_p8), %s133_s29, 4294965248  ;;  %vm173_vm0 = vcmask 261120   ;;  %v157_v0 = vld [vmem:[%s706_s30] sm:$0xff]  ;;  %v158_v1 = vld [vmem:[%s706_s30 + $0x8] sm:$0xff]  ;;  %s385_s17 = sshll.u32 %s586_s10, 1  ;;  %s383_s26 = sshll.u32 %s702_s28, 1 }
  0x28   : > { %v159_v2 = vld [vmem:[%s706_s30 + $0x10] sm:$0xff]  ;;  %v174_v3 = vsel %vm173_vm0, %v157_v0, 0.0  ;;  %v175_v4 = vsel %vm173_vm0, %v158_v1, 0.0  ;;  %v160_v6 = vld [vmem:[%s706_s30 + $0x18] sm:$0xff]  ;;  %v161_v9 = vld [vmem:[%s706_s30 + $0x20] sm:$0xff]  ;;  %v211_v14 = vmul.f32 %v157_v0, %v157_v0  ;;  %v212_v15 = vmul.f32 %v158_v1, %v158_v1  ;;  %s279_s21 = sadd.s32 %s582_s9, %s385_s17  ;;  %s155_s14 = scalar_lea.vmem [#allocation5], %s383_s26 }
  0x29   : > { %v177_v5 = vsel %vm173_vm0, %v159_v2, 0.0  ;;  %v176_v7 = vadd.f32 %v175_v4, %v174_v3  ;;  %v179_v8 = vsel %vm173_vm0, %v160_v6, 0.0  ;;  %v181_v11 = vsel %vm173_vm0, %v161_v9, 0.0  ;;  %v162_v12 = vld [vmem:[%s706_s30 + $0x28] sm:$0xff]  ;;  %v163_v18 = vld [vmem:[%s706_s30 + $0x30] sm:$0xff]  ;;  %v164_v23 = vld [vmem:[%s706_s30 + $0x38] sm:$0xff] }
  0x2a   : > { %v213_v16 = vmul.f32 %v159_v2, %v159_v2  ;;  %v183_v17 = vsel %vm173_vm0, %v162_v12, 0.0  ;;  %v214_v20 = vmul.f32 %v160_v6, %v160_v6  ;;  %v185_v21 = vsel %vm173_vm0, %v163_v18, 0.0  ;;  %v165_v30 = vld [vmem:[%s706_s30 + $0x40] sm:$0xff]  ;;  %v166_v36 = vld [vmem:[%s706_s30 + $0x48] sm:$0xff]  ;;  %v167_v42 = vld [vmem:[%s706_s30 + $0x50] sm:$0xff]  ;;  %s386_s2 = sshll.u32 %s279_s21, 1 }
  0x2b   : > { %v178_v10 = vadd.f32 %v177_v5, %v176_v7  ;;  %v215_v22 = vmul.f32 %v161_v9, %v161_v9  ;;  %v227_v25 = vsel %vm173_vm0, %v211_v14, 0.0  ;;  %v228_v26 = vsel %vm173_vm0, %v212_v15, 0.0  ;;  %v168_v48 = vld [vmem:[%s706_s30 + $0x58] sm:$0xff]  ;;  %v169_v54 = vld [vmem:[%s706_s30 + $0x60] sm:$0xff]  ;;  %v170_v60 = vld [vmem:[%s706_s30 + $0x68] sm:$0xff]  ;;  %s281_s5 = scalar_lea.hbm %s806_s1, %s386_s2  ;;  %s283_s10 = sshll.u32 %s155_s14, 4  ;;  %s284_s10 = int_to_ptr.vmem [resolvable:$true] %s283_s10 }
  0x2c   : > { %v230_v27 = vsel %vm173_vm0, %v213_v16, 0.0  ;;  %v187_v28 = vsel %vm173_vm0, %v164_v23, 0.0  ;;  %v229_v29 = vadd.f32 %v228_v26, %v227_v25  ;;  %v216_v32 = vmul.f32 %v162_v12, %v162_v12  ;;  %v171_v2 = vld [vmem:[%s706_s30 + $0x70] sm:$0xff]  ;;  %s285_s15 = sshll.u32 %s281_s5, 4  ;;  %s269_s9 = scalar_lea.sflag [#allocation4], %s702_s28  ;;  %s286_s15 = int_to_ptr.hbm [resolvable:$true] %s285_s15 }
  0x2d   : > { %v180_v13 = vadd.f32 %v179_v8, %v178_v10  ;;  %v232_v33 = vsel %vm173_vm0, %v214_v20, 0.0  ;;  %v189_v34 = vsel %vm173_vm0, %v165_v30, 0.0  ;;  %v217_v38 = vmul.f32 %v163_v18, %v163_v18  ;;  %v172_v8 = vld [vmem:[%s706_s30 + $0x78] sm:$0xff]  ;;  %s514_s19 = sshra.s32 %s286_s15, 4  ;;  %s520_s20 = scalar_lea.hbm %s806_s1, 8  ;;  %s515_s19 = int_to_ptr.hbm [resolvable:$true] %s514_s19 }
  0x2e   : > { %v231_v35 = vadd.f32 %v230_v27, %v229_v29  ;;  %v234_v39 = vsel %vm173_vm0, %v215_v22, 0.0  ;;  %v191_v40 = vsel %vm173_vm0, %v166_v36, 0.0  ;;  %v218_v44 = vmul.f32 %v164_v23, %v164_v23  ;;  %s516_s23 = scalar_lea.hbm %s515_s19, 2  ;;  %p521_p7 = scmp.lt.s32.totalorder %s515_s19, %s806_s1 }
  0x2f   : > { %v182_v19 = vadd.f32 %v181_v11, %v180_v13  ;;  %v236_v45 = vsel %vm173_vm0, %v216_v32, 0.0  ;;  %v193_v46 = vsel %vm173_vm0, %v167_v42, 0.0  ;;  %v219_v50 = vmul.f32 %v165_v30, %v165_v30  ;;  %p517_p3 = scmp.ne.s32.totalorder %s515_s19, %s516_s23  ;;  %p522_p8 = scmp.lt.s32.totalorder %s520_s20, %s516_s23 }
  0x30   : > { %v233_v41 = vadd.f32 %v232_v33, %v231_v35  ;;  %v238_v51 = vsel %vm173_vm0, %v217_v38, 0.0  ;;  %v195_v52 = vsel %vm173_vm0, %v168_v48, 0.0  ;;  %v220_v56 = vmul.f32 %v166_v36, %v166_v36 }
  0x31   : > { %v184_v24 = vadd.f32 %v183_v17, %v182_v19  ;;  %v240_v57 = vsel %vm173_vm0, %v218_v44, 0.0  ;;  %v197_v58 = vsel %vm173_vm0, %v169_v54, 0.0  ;;  %v221_v62 = vmul.f32 %v167_v42, %v167_v42  ;;  %p518_p5 = pnand %p517_p3, %p677_p9  ;;  %p523_p10 = por %p522_p8, %p521_p7 }
  0x32   : > { %v235_v47 = vadd.f32 %v234_v39, %v233_v41  ;;  %v242_v63 = vsel %vm173_vm0, %v219_v50, 0.0  ;;  %v199_v0 = vsel %vm173_vm0, %v170_v60, 0.0  ;;  %v222_v4 = vmul.f32 %v168_v48, %v168_v48 }
  0x33   : > { %v186_v31 = vadd.f32 %v185_v21, %v184_v24  ;;  %v244_v5 = vsel %vm173_vm0, %v220_v56, 0.0  ;;  %v201_v6 = vsel %vm173_vm0, %v171_v2, 0.0  ;;  %v223_v10 = vmul.f32 %v169_v54, %v169_v54  ;;  %p519_p6 = pneg %p518_p5 }
  0x34   : > { %v237_v53 = vadd.f32 %v236_v45, %v235_v47  ;;  %v246_v11 = vsel %vm173_vm0, %v221_v62, 0.0  ;;  %v203_v12 = vsel %vm173_vm0, %v172_v8, 0.0  ;;  %v224_v15 = vmul.f32 %v170_v60, %v170_v60 }
  0x35   : > { %v188_v37 = vadd.f32 %v187_v28, %v186_v31  ;;  %v248_v16 = vsel %vm173_vm0, %v222_v4, 0.0  ;;  %v225_v19 = vmul.f32 %v171_v2, %v171_v2  ;;  %v250_v20 = vsel %vm173_vm0, %v223_v10, 0.0  ;;  %p524_p11 = pnand %p523_p10, %p519_p6 }
  0x36   : > { %v239_v59 = vadd.f32 %v238_v51, %v237_v53  ;;  %v226_v23 = vmul.f32 %v172_v8, %v172_v8  ;;  %v252_v24 = vsel %vm173_vm0, %v224_v15, 0.0  ;;  %vm264_vm1 = vcmask 1040384  }
  0x37   : > { %v190_v43 = vadd.f32 %v189_v34, %v188_v37  ;;  %v254_v27 = vsel %vm173_vm0, %v225_v19, 0.0  ;;  %vm266_vm2 = vcmask 254976  }
  0x38   : > { %v241_v1 = vadd.f32 %v240_v57, %v239_v59  ;;  %v256_v29 = vsel %vm173_vm0, %v226_v23, 0.0 }
  0x39   : > { %v192_v49 = vadd.f32 %v191_v40, %v190_v43 }
  0x3a   : > { %v243_v7 = vadd.f32 %v242_v63, %v241_v1 }
  0x3b   : > { %v194_v55 = vadd.f32 %v193_v46, %v192_v49 }
  0x3c   : > { %v245_v13 = vadd.f32 %v244_v5, %v243_v7 }
  0x3d   : > { %v196_v61 = vadd.f32 %v195_v52, %v194_v55 }
  0x3e   : > { %v247_v17 = vadd.f32 %v246_v11, %v245_v13 }
  0x3f   : > { %v198_v3 = vadd.f32 %v197_v58, %v196_v61 }
  0x40   : > { %v249_v21 = vadd.f32 %v248_v16, %v247_v17 }
  0x41   : > { %v200_v9 = vadd.f32 %v199_v0, %v198_v3 }
  0x42   : > { %v251_v25 = vadd.f32 %v250_v20, %v249_v21 }
  0x43   : > { %v202_v14 = vadd.f32 %v201_v6, %v200_v9 }
  0x44   : > { %v253_v28 = vadd.f32 %v252_v24, %v251_v25 }
  0x45   : > { %v204_v18 = vadd.f32 %v203_v12, %v202_v14 }
  0x46   : > { %v255_v31 = vadd.f32 %v254_v27, %v253_v28 }
  0x47   : > { %v205_v22 = vrot.slane %v204_v18, 4 }
  0x48   : > { %v257_v32 = vadd.f32 %v256_v29, %v255_v31 }
  0x49   : > { %v206_v26 = vadd.f32 %v205_v22, %v204_v18 }
  0x4a   : > { %v258_v34 = vrot.slane %v257_v32, 4 }
  0x4b   : > { %v207_v30 = vrot.slane %v206_v26, 2 }
  0x4c   : > { %v259_v35 = vadd.f32 %v258_v34, %v257_v32 }
  0x4d   : > { %v208_v33 = vadd.f32 %v207_v30, %v206_v26 }
  0x4e   : > { %v260_v37 = vrot.slane %v259_v35, 2 }
  0x4f   : > { %v209_v36 = vrot.slane %v208_v33, 1 }
  0x50   : > { %v261_v38 = vadd.f32 %v260_v37, %v259_v35 }
  0x51   : > { %v210_v39 = vadd.f32 %v209_v36, %v208_v33 }
  0x52   : > { %v262_v40 = vrot.slane %v261_v38, 1 }
  0x54   : > { %v263_v41 = vadd.f32 %v262_v40, %v261_v38 }
  0x56   : > { %v265_v42 = vsel %vm264_vm1, %v210_v39, %v263_v41 }
  0x57   : > { %267 = vst.msk [vmem:[%s155_s14] sm:$0x3] %vm266_vm2, %v265_v42 }
  0x58   : > { %527 = shalt.err (!%p524_p11)
}
  0x59   : > { %392 = dma.vmem_to_hbm [thread:$0]  (%p677_p9), %s284_s10, 32, %s286_s15, %s269_s9  }
  0x5a PF: > { %p403_p13 = scmp.ge.s32.totalorder %s598_s13, 2  ;;  %s297_s28 = sand.u32 1, %s570_s6  }
  0x5b   : > { %s298_s17 = scalar_lea.sflag [#allocation4], %s297_s28 }
  0x5c   : > { %p399_p0 = pnand %p403_p13, %p683_p12 }
  0x5e   : > { %p400_p1 = pneg %p399_p0 }
  0x60   : > { %565 = dma.done.wait (%p400_p1), %s298_s17, 32  }
  0x61   : > { %567 = vsyncadd (%p400_p1), %s298_s17, 4294967264  ;;  %s17_s13 = sadd.s32 1, %s598_s13   ;;  %s813_s22 = sld [smem:[#allocation8_spill]] }
  0x62   : > { %p14_p2 = scmp.ge.s32.totalorder %s17_s13, 6   ;;  %s814_s6 = smov %s574_s7 }
  0x63   : > { %s815_s7 = smov %s578_s8  ;;  %s816_s8 = smov %s690_s27 }
  0x64   : > { %s817_s9 = smov %s590_s11  ;;  %s818_s10 = smov %s594_s12 }
  0x65   : > { %s819_s11 = smov %s822_s16  ;;  %16 = sbr.rel (!%p14_p2) target bundleno = 7 (0x7), region = 69 }
  0x67   : > { %s820_s12 = smov %s813_s22 }
  0x6a   :  { %304 = vsyncpa [#allocation3], 1 }
  0x6b   :  { %306 = vsyncpa [#allocation3 + $0x1], 1 }
  0x6c   :  { %307 = vsyncpa [#allocation4], 1 }
  0x6d   :  { %309 = vsyncpa [#allocation4 + $0x1], 1 }

</bundles_post_ra>
